<compile_context>
chip_gen: v7x
topology: tpu7x:2x2x1
jax: 0.10.0
libtpu: 0.0.40
codegen_flags: <defaults>
</compile_context>

<pallas_src>
import jax
import jax.numpy as jnp
from jax.experimental import pallas as pl
from jax.experimental.pallas import tpu as pltpu

_LANE = 128
_SUBLANE = 8
# Keep (in + out) double-buffered blocks comfortably under the smallest scoped
# VMEM default (16 MiB on v5e): <= ~2 MiB per block.
_BLOCK_BYTES_BUDGET = 2 * 1024 * 1024


def _identity_copy_kernel(f_ref, o_ref):
    # Pure copy: no per-element ops, so the single vst slot on v5e stays free.
    o_ref[...] = f_ref[...]


def factor_analysis_encoder(x, factors, *, force_kernel=True):
    """Pallas implementation of FactorAnalysisEncoder.forward(x, factors).

    `x` is ignored by the module, so it is deliberately NOT passed to the
    pallas_call (no unused HBM ref -> no scheduling dependency on x).
    """
    del x  # forward ignores x entirely
    if not force_kernel:
        # Optimal path: identity needs no kernel and no HBM round-trip.
        return factors

    B, F = factors.shape
    total = B * F

    # Present the data lane-dense to the kernel: (rows, 128) when possible so
    # stores are unmasked full-vreg `vst`; otherwise one full-array block.
    if total >= _LANE and total % _LANE == 0:
        flat = factors.reshape(total // _LANE, _LANE)
    else:
        flat = factors.reshape(1, total)
    R, C = flat.shape

    # Largest row-block (multiple of 8 sublanes) that divides R and fits budget.
    bytes_per_row = C * flat.dtype.itemsize
    block_rows = min(R, max(_SUBLANE, _BLOCK_BYTES_BUDGET // max(bytes_per_row, 1)))
    if block_rows < R:
        block_rows = (block_rows // _SUBLANE) * _SUBLANE
        while block_rows > _SUBLANE and R % block_rows != 0:
            block_rows -= _SUBLANE
        if block_rows < _SUBLANE or R % block_rows != 0:
            block_rows = R  # fall back to one full-array block (always legal)
    grid = (R // block_rows,)

    out_flat = pl.pallas_call(
        _identity_copy_kernel,
        out_shape=jax.ShapeDtypeStruct((R, C), flat.dtype),
        grid_spec=pltpu.PrefetchScalarGridSpec(
            num_scalar_prefetch=0,
            grid=grid,
            in_specs=[pl.BlockSpec((block_rows, C), lambda i: (i, 0))],
            out_specs=pl.BlockSpec((block_rows, C), lambda i: (i, 0)),
        ),
        compiler_params=pltpu.CompilerParams(
            # batch axis is independent -> shards across both TCs on v7x
            dimension_semantics=("parallel",),
        ),
        # Output buffer aliases the factors input: no extra HBM allocation.
        input_output_aliases={0: 0},
    )(flat)
    return out_flat.reshape(B, F)


if __name__ == "__main__":
    key = jax.random.PRNGKey(0)
    kx, kf = jax.random.split(key)

    # Small shapes consistent with the module's forward signature.
    x = jax.random.normal(kx, (2, 4, 16, 16), dtype=jnp.float32)   # [B, C, H, W]
    factors = jax.random.normal(kf, (2, 32), dtype=jnp.float32)    # [B, F]

    # Host copy for the reference check (robust to output/input buffer aliasing).
    expected = jax.device_get(factors)

    out = factor_analysis_encoder(x, factors)
    out = jax.block_until_ready(out)

    assert out.shape == factors.shape and out.dtype == factors.dtype
    assert bool((jax.device_get(out) == expected).all())
    print("KERNEL_OK")
</pallas_src>

<mosaic_0001>
module attributes {stable_mosaic.version = 11 : i64} {
  func.func @_identity_copy_kernel(%arg0: i32, %arg1: memref<1x64xf32, #tpu.memory_space<vmem>>, %arg2: memref<1x64xf32, #tpu.memory_space<vmem>>) attributes {dimension_semantics = [#tpu.dimension_semantics<parallel>], iteration_bounds = array<i64: 1>, scalar_prefetch = 0 : i64, scratch_operands = 0 : i64, tpu.core_type = #tpu.core_type<tc>, window_params = [{transform_indices = @transform_0, window_bounds = array<i64: 1, 64>}, {transform_indices = @transform_1, window_bounds = array<i64: 1, 64>}]} {
    %c0 = arith.constant 0 : index
    %c0_0 = arith.constant 0 : index
    %0 = vector.load %arg1[%c0, %c0_0] : memref<1x64xf32, #tpu.memory_space<vmem>>, vector<1x64xf32>
    %c0_1 = arith.constant 0 : index
    %c0_2 = arith.constant 0 : index
    %1 = vector.load %arg2[%c0_1, %c0_2] : memref<1x64xf32, #tpu.memory_space<vmem>>, vector<1x64xf32>
    tpu.vector_store %arg2[%c0_1, %c0_2], %0 {strides = array<i32>} : memref<1x64xf32, #tpu.memory_space<vmem>>, vector<1x64xf32>,
    return
  }
  func.func @transform_0(%arg0: i32) -> (i32, i32) {
    %c0_i32 = arith.constant 0 : i32
    %c0_i32_0 = arith.constant 0 : i32
    return %arg0, %c0_i32 : i32, i32
  }
  func.func @transform_1(%arg0: i32) -> (i32, i32) {
    %c0_i32 = arith.constant 0 : i32
    %c0_i32_0 = arith.constant 0 : i32
    return %arg0, %c0_i32 : i32, i32
  }
}

</mosaic_0001>

<bundles_post_ra>
// kernel: tpu_custom_call.1
= control target key start
LH: loop header
LB: loop body
LE: loop exit
PB: predicated region body
PF: predicated region fallthrough
CT: control target
= control target key end

     0   :  { %6 = vsyncpa [#allocation3], 0  ;;  %s125_s0 = inlined_call_operand.hbm [shape: f32[1,64], index: 0, kind: input, shape index: {}, may-alias: {0,1}]   ;;  %s126_s1 = inlined_call_operand.hbm [shape: f32[1,64], index: 1, kind: output, shape index: {}, may-alias: {0,1}]  }
   0x1   :  { %7 = vsyncpa [#allocation4], 0  ;;  %s89_s6 = smov [#allocation2]   ;;  %s41_s10 = scalar_lea.hbm %s125_s0, 16 }
   0x2   :  { %s14_s7 = sshll.u32 %s89_s6, 4  ;;  %p42_p0 = scmp.ne.s32.totalorder %s125_s0, %s41_s10  ;;  %s15_s7 = int_to_ptr.vmem [resolvable:$true] %s14_s7 }
   0x3   :  { %p45_p1 = scmp.lt.u32.totalorder %s41_s10, %s125_s0 }
   0x5   :  { %p47_p2 = pnand %p45_p1, %p42_p0 }
   0x7   :  { %50 = shalt.err (!%p47_p2)
}
   0x8   :  { %s51_s15 = scalar_lea.vmem %s15_s7, 16  ;;  %s55_s16 = scalar_lea.vmem %s15_s7, 32 }
   0x9   :  { %p52_p3 = scmp.ne.s32.totalorder %s15_s7, %s51_s15  ;;  %p56_p4 = scmp.lt.s32.totalorder %s15_s7, %s15_s7 }
   0xa   :  { %p57_p5 = scmp.lt.s32.totalorder %s55_s16, %s51_s15 }
   0xc   :  { %p58_p6 = por %p57_p5, %p56_p4 }
   0xe   :  { %p59_p7 = pnand %p58_p6, %p52_p3 }
  0x10   :  { %62 = shalt.err (!%p59_p7)
}
  0x11   :  { %17 = dma.hbm_to_vmem [thread:$0]  %s125_s0, 16, %s15_s7, [#allocation3]  }
  0x12   :  { %85 = dma.done.wait [#allocation3], 16  }
  0x13   :  { %86 = vsyncadd [#allocation3], 4294967280  ;;  %s90_s19 = smov [#allocation5]   ;;  %vm22_vm0 = vcmask 516096   ;;  %v21_v0 = vld [vmem:[#allocation2] sm:$0x1] }
  0x14   :  { %s30_s20 = sshll.u32 %s90_s19, 4  ;;  %23 = vst.msk [vmem:[#allocation5] sm:$0x1] %vm22_vm0, %v21_v0  ;;  %s31_s20 = int_to_ptr.vmem [resolvable:$true] %s30_s20 }
  0x15   :  { %s63_s21 = scalar_lea.vmem %s31_s20, 16  ;;  %s67_s22 = scalar_lea.vmem %s31_s20, 32 }
  0x16   :  { %p64_p8 = scmp.ne.s32.totalorder %s31_s20, %s63_s21  ;;  %p68_p9 = scmp.lt.s32.totalorder %s31_s20, %s31_s20 }
  0x17   :  { %p69_p10 = scmp.lt.s32.totalorder %s67_s22, %s63_s21 }
  0x19   :  { %p70_p11 = por %p69_p10, %p68_p9 }
  0x1b   :  { %p71_p12 = pnand %p70_p11, %p64_p8 }
  0x1d   :  { %74 = shalt.err (!%p71_p12)
}
  0x1e   :  { %s75_s0 = scalar_lea.hbm %s126_s1, 16 }
  0x1f   :  { %p76_p13 = scmp.ne.s32.totalorder %s126_s1, %s75_s0  ;;  %p79_p0 = scmp.lt.u32.totalorder %s75_s0, %s126_s1 }
  0x21   :  { %p81_p1 = pnand %p79_p0, %p76_p13 }
  0x23   :  { %84 = shalt.err (!%p81_p1)
}
  0x24   :  { %33 = dma.vmem_to_hbm [thread:$0]  %s31_s20, 16, %s126_s1, [#allocation4]  }
  0x25   :  { %87 = dma.done.wait [#allocation4], 16  }
  0x26   :  { %88 = vsyncadd [#allocation4], 4294967280 }
  0x27   :  { %37 = vsyncpa [#allocation3], 1 }
  0x28   :  { %38 = vsyncpa [#allocation4], 1 }

</bundles_post_ra>
